<compile_context>
chip_gen: v7x
topology: tpu7x:2x2x1
jax: 0.10.0
libtpu: 0.0.40
codegen_flags: <defaults>
</compile_context>

<pallas_src>
import math

import jax
import jax.numpy as jnp
from jax import lax
from jax.experimental import pallas as pl
from jax.experimental.pallas import tpu as pltpu

_LN_EPS = 1e-5  # nn.LayerNorm default


def _msef_kernel_factory(C: int, H: int, W: int, Cr: int, eps: float):
    HW = H * W
    P = W + 1  # flat-lane zero pad on each side of the spatial slab

    def kernel(ln_g_ref, ln_b_ref, dw_w_ref, dw_b_ref,
               w1t_ref, b1_ref, w2_ref, b2_ref,
               x_ref, o_ref, xp_ref):
        # x_ref block: (1, C, HW)
        x = x_ref[0].astype(jnp.float32)                      # (C, HW)

        # ---- LayerNorm over channels (sublane-axis reduction) ----
        mu = jnp.mean(x, axis=0, keepdims=True)               # (1, HW)
        xc = x - mu
        var = jnp.mean(xc * xc, axis=0, keepdims=True)        # (1, HW)
        xn = xc * lax.rsqrt(var + eps)
        xn = xn * ln_g_ref[...] + ln_b_ref[...]                # (C, HW)

        # ---- SE branch: spatial mean (lane reduction) + two tiny FCs ----
        y = jnp.sum(xn, axis=1, keepdims=True) * (1.0 / HW)    # (C, 1)
        h = jnp.sum(w1t_ref[...] * y, axis=0, keepdims=True) + b1_ref[...]  # (1, Cr)
        h = jnp.maximum(h, 0.0)                                # relu
        s = jnp.sum(w2_ref[...] * h, axis=1, keepdims=True) + b2_ref[...]   # (C, 1)
        s = jnp.tanh(s)
        x2 = xn * s                                            # (C, HW)

        # ---- 3x3 depthwise conv on xn (zero padding 1) ----
        # Stage xn into a flat-lane zero-padded scratch; each of the 9 taps is a
        # statically shifted (C, HW) window.  H-boundary taps land in the zero
        # pads; W-boundary (row wrap) taps are masked with lane-index masks.
        zpad = jnp.zeros((C, P), dtype=jnp.float32)
        xp_ref[:, 0:P] = zpad
        xp_ref[:, P + HW:P + HW + P] = zpad
        xp_ref[:, P:P + HW] = xn

        w_idx = lax.broadcasted_iota(jnp.int32, (1, HW), 1) % W
        left_ok = w_idx >= 1            # source column (w-1) is in-bounds
        right_ok = w_idx <= (W - 2)     # source column (w+1) is in-bounds

        acc = jnp.zeros((C, HW), dtype=jnp.float32)
        for kh in range(3):             # static, fully unrolled (9 taps)
            dh = kh - 1
            for kw in range(3):
                dw = kw - 1
                start = P + dh * W + dw
                shifted = xp_ref[:, start:start + HW]          # (C, HW)
                if dw == -1:
                    shifted = jnp.where(left_ok, shifted, 0.0)
                elif dw == 1:
                    shifted = jnp.where(right_ok, shifted, 0.0)
                j = kh * 3 + kw
                tap = dw_w_ref[:, j:j + 1]                     # (C, 1)
                acc = acc + tap * shifted
        x1 = acc + dw_b_ref[...]                               # (C, HW)

        # ---- fuse + residual ----
        o_ref[0] = (x1 * x2 + x).astype(o_ref.dtype)

    return kernel


def msef_forward(x, ln_gamma, ln_beta, dw_weight, dw_bias,
                 fc1_w, fc1_b, fc2_w, fc2_b):
    """x: (N, C, H, W). Params follow the PyTorch module's shapes."""
    N, C, H, W = x.shape
    HW = H * W
    Cr = fc1_w.shape[0]                 # C // 16 in the module

    f32 = jnp.float32
    x3 = x.reshape(N, C, HW)
    ln_g = ln_gamma.astype(f32).reshape(C, 1)
    ln_b = ln_beta.astype(f32).reshape(C, 1)
    dw_w = dw_weight.astype(f32).reshape(C, 9)   # (C,1,3,3) -> (C,9)
    dw_b = dw_bias.astype(f32).reshape(C, 1)
    w1t = fc1_w.astype(f32).T                    # (Cr,C) -> (C,Cr)
    b1 = fc1_b.astype(f32).reshape(1, Cr)
    w2 = fc2_w.astype(f32).reshape(C, Cr)
    b2 = fc2_b.astype(f32).reshape(C, 1)

    kernel = _msef_kernel_factory(C, H, W, Cr, _LN_EPS)

    # Explicit VMEM budget: double-buffered in/out slabs + padded conv scratch.
    slab = C * HW * 4
    vmem_limit = int(min(96 * 1024 * 1024, max(4 * 1024 * 1024, 8 * slab)))

    itemsize = jnp.dtype(x.dtype).itemsize
    cost = pl.CostEstimate(
        flops=30 * N * C * HW,
        transcendentals=N * (HW + C),
        bytes_accessed=2 * N * C * HW * itemsize,
    )

    grid_spec = pltpu.PrefetchScalarGridSpec(
        num_scalar_prefetch=0,
        grid=(N,),
        in_specs=[
            pl.BlockSpec((C, 1), lambda n: (0, 0)),    # ln gamma
            pl.BlockSpec((C, 1), lambda n: (0, 0)),    # ln beta
            pl.BlockSpec((C, 9), lambda n: (0, 0)),    # depthwise taps
            pl.BlockSpec((C, 1), lambda n: (0, 0)),    # depthwise bias
            pl.BlockSpec((C, Cr), lambda n: (0, 0)),   # fc1 weight (transposed)
            pl.BlockSpec((1, Cr), lambda n: (0, 0)),   # fc1 bias
            pl.BlockSpec((C, Cr), lambda n: (0, 0)),   # fc2 weight
            pl.BlockSpec((C, 1), lambda n: (0, 0)),    # fc2 bias
            pl.BlockSpec((1, C, HW), lambda n: (n, 0, 0)),   # x slab
        ],
        out_specs=pl.BlockSpec((1, C, HW), lambda n: (n, 0, 0)),
        scratch_shapes=[pltpu.VMEM((C, HW + 2 * (W + 1)), jnp.float32)],
    )

    out = pl.pallas_call(
        kernel,
        out_shape=jax.ShapeDtypeStruct((N, C, HW), x.dtype),
        grid_spec=grid_spec,
        compiler_params=pltpu.CompilerParams(
            dimension_semantics=("parallel",),
            vmem_limit_bytes=vmem_limit,
        ),
        cost_estimate=cost,
    )(ln_g, ln_b, dw_w, dw_b, w1t, b1, w2, b2, x3)
    return out.reshape(N, C, H, W)


def msef_reference(x, ln_gamma, ln_beta, dw_weight, dw_bias,
                   fc1_w, fc1_b, fc2_w, fc2_b, eps=_LN_EPS):
    """Pure-JAX reference mirroring the PyTorch MSEFBlock forward."""
    N, C, H, W = x.shape
    xt = jnp.transpose(x, (0, 2, 3, 1)).astype(jnp.float32)    # NHWC
    mu = xt.mean(-1, keepdims=True)
    var = ((xt - mu) ** 2).mean(-1, keepdims=True)
    xn = (xt - mu) / jnp.sqrt(var + eps) * ln_gamma + ln_beta
    xn = jnp.transpose(xn, (0, 3, 1, 2))                       # NCHW
    x1 = lax.conv_general_dilated(
        xn, dw_weight.astype(jnp.float32),
        window_strides=(1, 1), padding=((1, 1), (1, 1)),
        dimension_numbers=("NCHW", "OIHW", "NCHW"),
        feature_group_count=C) + dw_bias.reshape(1, C, 1, 1)
    y = xn.mean(axis=(2, 3))                                   # (N, C)
    h = jax.nn.relu(y @ fc1_w.T + fc1_b)
    s = jnp.tanh(h @ fc2_w.T + fc2_b)
    x2 = xn * s[:, :, None, None]
    return (x1 * x2 + x.astype(jnp.float32)).astype(x.dtype)


if __name__ == "__main__":
    # filters must be >= 16 so the SE reduction (C // 16) is non-degenerate.
    N, C, H, W = 2, 16, 16, 16
    Cr = C // 16

    key = jax.random.PRNGKey(0)
    kx, kdw, k1, k2 = jax.random.split(key, 4)
    x = jax.random.normal(kx, (N, C, H, W), dtype=jnp.float32)

    # Deterministic stand-ins for the PyTorch inits.
    ln_gamma = jnp.ones((C,), jnp.float32)
    ln_beta = jnp.zeros((C,), jnp.float32)
    dw_bound = math.sqrt(6.0 / 9.0)                 # kaiming_uniform, fan_in=9
    dw_weight = jax.random.uniform(kdw, (C, 1, 3, 3), minval=-dw_bound,
                                   maxval=dw_bound, dtype=jnp.float32)
    dw_bias = jnp.zeros((C,), jnp.float32)
    b1 = math.sqrt(6.0 / C)                         # kaiming_uniform, fan_in=C
    fc1_w = jax.random.uniform(k1, (Cr, C), minval=-b1, maxval=b1,
                               dtype=jnp.float32)
    fc1_b = jnp.zeros((Cr,), jnp.float32)
    b2 = math.sqrt(6.0 / Cr)                        # kaiming_uniform, fan_in=Cr
    fc2_w = jax.random.uniform(k2, (C, Cr), minval=-b2, maxval=b2,
                               dtype=jnp.float32)
    fc2_b = jnp.zeros((C,), jnp.float32)

    out = msef_forward(x, ln_gamma, ln_beta, dw_weight, dw_bias,
                       fc1_w, fc1_b, fc2_w, fc2_b)
    out = jax.block_until_ready(out)

    ref = msef_reference(x, ln_gamma, ln_beta, dw_weight, dw_bias,
                         fc1_w, fc1_b, fc2_w, fc2_b)
    assert out.shape == (N, C, H, W)
    max_err = float(jnp.max(jnp.abs(out - ref)))
    assert jnp.allclose(out, ref, atol=2e-4, rtol=2e-4), f"mismatch: {max_err}"
    print("KERNEL_OK")
</pallas_src>

<mosaic_0001>
module attributes {stable_mosaic.version = 11 : i64} {
  func.func @kernel(%arg0: i32, %arg1: memref<16x1xf32, #tpu.memory_space<vmem>>, %arg2: memref<16x1xf32, #tpu.memory_space<vmem>>, %arg3: memref<16x9xf32, #tpu.memory_space<vmem>>, %arg4: memref<16x1xf32, #tpu.memory_space<vmem>>, %arg5: memref<16x1xf32, #tpu.memory_space<vmem>>, %arg6: memref<1x1xf32, #tpu.memory_space<vmem>>, %arg7: memref<16x1xf32, #tpu.memory_space<vmem>>, %arg8: memref<16x1xf32, #tpu.memory_space<vmem>>, %arg9: memref<1x16x256xf32, #tpu.memory_space<vmem>>, %arg10: memref<1x16x256xf32, #tpu.memory_space<vmem>>, %arg11: memref<16x290xf32, #tpu.memory_space<vmem>>) attributes {dimension_semantics = [#tpu.dimension_semantics<parallel>], iteration_bounds = array<i64: 2>, scalar_prefetch = 0 : i64, scratch_operands = 1 : i64, tpu.core_type = #tpu.core_type<tc>, window_params = [{pipeline_mode = #tpu.pipeline_mode<synchronous>, transform_indices = @transform_0, window_bounds = array<i64: 16, 1>}, {pipeline_mode = #tpu.pipeline_mode<synchronous>, transform_indices = @transform_1, window_bounds = array<i64: 16, 1>}, {pipeline_mode = #tpu.pipeline_mode<synchronous>, transform_indices = @transform_2, window_bounds = array<i64: 16, 9>}, {pipeline_mode = #tpu.pipeline_mode<synchronous>, transform_indices = @transform_3, window_bounds = array<i64: 16, 1>}, {pipeline_mode = #tpu.pipeline_mode<synchronous>, transform_indices = @transform_4, window_bounds = array<i64: 16, 1>}, {pipeline_mode = #tpu.pipeline_mode<synchronous>, transform_indices = @transform_5, window_bounds = array<i64: 1, 1>}, {pipeline_mode = #tpu.pipeline_mode<synchronous>, transform_indices = @transform_6, window_bounds = array<i64: 16, 1>}, {pipeline_mode = #tpu.pipeline_mode<synchronous>, transform_indices = @transform_7, window_bounds = array<i64: 16, 1>}, {transform_indices = @transform_8, window_bounds = array<i64: 1, 16, 256>}, {transform_indices = @transform_9, window_bounds = array<i64: 1, 16, 256>}]} {
    %c0 = arith.constant 0 : index
    %c0_0 = arith.constant 0 : index
    %c0_1 = arith.constant 0 : index
    %0 = vector.load %arg9[%c0, %c0_0, %c0_1] : memref<1x16x256xf32, #tpu.memory_space<vmem>>, vector<1x16x256xf32>
    %1 = vector.shape_cast %0 : vector<1x16x256xf32> to vector<16x256xf32>
    %cst = arith.constant dense<0.000000e+00> : vector<256xf32>
    %2 = vector.multi_reduction <add>, %1, %cst [0] : vector<16x256xf32> to vector<256xf32>
    %3 = vector.shape_cast %2 : vector<256xf32> to vector<1x256xf32>
    %cst_2 = arith.constant 1.600000e+01 : f32
    %4 = vector.broadcast %cst_2 : f32 to vector<1x256xf32>
    %5 = arith.divf %3, %4 : vector<1x256xf32>
    %6 = vector.broadcast %5 : vector<1x256xf32> to vector<16x256xf32>
    %7 = arith.subf %1, %6 : vector<16x256xf32>
    %8 = arith.mulf %7, %7 : vector<16x256xf32>
    %cst_3 = arith.constant dense<0.000000e+00> : vector<256xf32>
    %9 = vector.multi_reduction <add>, %8, %cst_3 [0] : vector<16x256xf32> to vector<256xf32>
    %10 = vector.shape_cast %9 : vector<256xf32> to vector<1x256xf32>
    %cst_4 = arith.constant 1.600000e+01 : f32
    %11 = vector.broadcast %cst_4 : f32 to vector<1x256xf32>
    %12 = arith.divf %10, %11 : vector<1x256xf32>
    %cst_5 = arith.constant 9.99999974E-6 : f32
    %13 = vector.broadcast %cst_5 : f32 to vector<1x256xf32>
    %14 = arith.addf %12, %13 : vector<1x256xf32>
    %15 = math.rsqrt %14 : vector<1x256xf32>
    %16 = vector.broadcast %15 : vector<1x256xf32> to vector<16x256xf32>
    %17 = arith.mulf %7, %16 : vector<16x256xf32>
    %c0_6 = arith.constant 0 : index
    %c0_7 = arith.constant 0 : index
    %18 = vector.load %arg1[%c0_6, %c0_7] : memref<16x1xf32, #tpu.memory_space<vmem>>, vector<16x1xf32>
    %19 = vector.broadcast %18 : vector<16x1xf32> to vector<16x256xf32>
    %20 = arith.mulf %17, %19 : vector<16x256xf32>
    %c0_8 = arith.constant 0 : index
    %c0_9 = arith.constant 0 : index
    %21 = vector.load %arg2[%c0_8, %c0_9] : memref<16x1xf32, #tpu.memory_space<vmem>>, vector<16x1xf32>
    %22 = vector.broadcast %21 : vector<16x1xf32> to vector<16x256xf32>
    %23 = arith.addf %20, %22 : vector<16x256xf32>
    %cst_10 = arith.constant dense<0.000000e+00> : vector<16xf32>
    %24 = vector.multi_reduction <add>, %23, %cst_10 [1] : vector<16x256xf32> to vector<16xf32>
    %25 = vector.shape_cast %24 : vector<16xf32> to vector<16x1xf32>
    %cst_11 = arith.constant 3.906250e-03 : f32
    %26 = vector.broadcast %cst_11 : f32 to vector<16x1xf32>
    %27 = arith.mulf %25, %26 : vector<16x1xf32>
    %c0_12 = arith.constant 0 : index
    %c0_13 = arith.constant 0 : index
    %28 = vector.load %arg5[%c0_12, %c0_13] : memref<16x1xf32, #tpu.memory_space<vmem>>, vector<16x1xf32>
    %29 = arith.mulf %28, %27 : vector<16x1xf32>
    %cst_14 = arith.constant dense<0.000000e+00> : vector<1xf32>
    %30 = vector.multi_reduction <add>, %29, %cst_14 [0] : vector<16x1xf32> to vector<1xf32>
    %31 = vector.shape_cast %30 : vector<1xf32> to vector<1x1xf32>
    %c0_15 = arith.constant 0 : index
    %c0_16 = arith.constant 0 : index
    %32 = vector.load %arg6[%c0_15, %c0_16] : memref<1x1xf32, #tpu.memory_space<vmem>>, vector<1x1xf32>
    %33 = arith.addf %31, %32 : vector<1x1xf32>
    %cst_17 = arith.constant 0.000000e+00 : f32
    %34 = vector.broadcast %cst_17 : f32 to vector<1x1xf32>
    %35 = arith.maximumf %33, %34 : vector<1x1xf32>
    %c0_18 = arith.constant 0 : index
    %c0_19 = arith.constant 0 : index
    %36 = vector.load %arg7[%c0_18, %c0_19] : memref<16x1xf32, #tpu.memory_space<vmem>>, vector<16x1xf32>
    %37 = vector.broadcast %35 : vector<1x1xf32> to vector<16x1xf32>
    %38 = arith.mulf %36, %37 : vector<16x1xf32>
    %cst_20 = arith.constant dense<0.000000e+00> : vector<16xf32>
    %39 = vector.multi_reduction <add>, %38, %cst_20 [1] : vector<16x1xf32> to vector<16xf32>
    %40 = vector.shape_cast %39 : vector<16xf32> to vector<16x1xf32>
    %c0_21 = arith.constant 0 : index
    %c0_22 = arith.constant 0 : index
    %41 = vector.load %arg8[%c0_21, %c0_22] : memref<16x1xf32, #tpu.memory_space<vmem>>, vector<16x1xf32>
    %42 = arith.addf %40, %41 : vector<16x1xf32>
    %43 = math.tanh %42 : vector<16x1xf32>
    %44 = vector.broadcast %43 : vector<16x1xf32> to vector<16x256xf32>
    %45 = arith.mulf %23, %44 : vector<16x256xf32>
    %cst_23 = arith.constant 0.000000e+00 : f32
    %46 = vector.broadcast %cst_23 : f32 to vector<16x17xf32>
    %c0_24 = arith.constant 0 : index
    %c0_25 = arith.constant 0 : index
    %47 = vector.load %arg11[%c0_24, %c0_25] : memref<16x290xf32, #tpu.memory_space<vmem>>, vector<16x17xf32>
    tpu.vector_store %arg11[%c0_24, %c0_25], %46 {strides = array<i32>} : memref<16x290xf32, #tpu.memory_space<vmem>>, vector<16x17xf32>,
    %c0_26 = arith.constant 0 : index
    %c273 = arith.constant 273 : index
    %48 = vector.load %arg11[%c0_26, %c273] : memref<16x290xf32, #tpu.memory_space<vmem>>, vector<16x17xf32>
    tpu.vector_store %arg11[%c0_26, %c273], %46 {strides = array<i32>} : memref<16x290xf32, #tpu.memory_space<vmem>>, vector<16x17xf32>,
    %c0_27 = arith.constant 0 : index
    %c17 = arith.constant 17 : index
    %49 = vector.load %arg11[%c0_27, %c17] : memref<16x290xf32, #tpu.memory_space<vmem>>, vector<16x256xf32>
    tpu.vector_store %arg11[%c0_27, %c17], %23 {strides = array<i32>} : memref<16x290xf32, #tpu.memory_space<vmem>>, vector<16x256xf32>,
    %50 = tpu.iota {dimensions = array<i32: 1>} : vector<1x256xi32>
    %c16_i32 = arith.constant 16 : i32
    %c0_i32 = arith.constant 0 : i32
    %51 = arith.cmpi eq, %c16_i32, %c0_i32 : i32
    %c1_i32 = arith.constant 1 : i32
    %52 = arith.select %51, %c1_i32, %c16_i32 : i32
    %53 = vector.broadcast %52 : i32 to vector<1x256xi32>
    %54 = arith.remsi %50, %53 : vector<1x256xi32>
    %c0_i32_28 = arith.constant 0 : i32
    %55 = vector.broadcast %c0_i32_28 : i32 to vector<1x256xi32>
    %56 = arith.cmpi ne, %54, %55 : vector<1x256xi32>
    %c0_i32_29 = arith.constant 0 : i32
    %57 = vector.broadcast %c0_i32_29 : i32 to vector<1x256xi32>
    %58 = arith.cmpi slt, %54, %57 : vector<1x256xi32>
    %c0_i32_30 = arith.constant 0 : i32
    %59 = arith.cmpi slt, %52, %c0_i32_30 : i32
    %60 = vector.broadcast %59 : i1 to vector<1x256xi1>
    %61 = vector.broadcast %60 : vector<1x256xi1> to vector<1x256xi1>
    %62 = arith.xori %58, %61 : vector<1x256xi1>
    %63 = arith.andi %62, %56 : vector<1x256xi1>
    %64 = vector.broadcast %52 : i32 to vector<1x256xi32>
    %65 = arith.addi %54, %64 : vector<1x256xi32>
    %66 = arith.select %63, %65, %54 : vector<1x256xi1>, vector<1x256xi32>
    %c1_i32_31 = arith.constant 1 : i32
    %67 = vector.broadcast %c1_i32_31 : i32 to vector<1x256xi32>
    %68 = arith.cmpi sge, %66, %67 : vector<1x256xi32>
    %c14_i32 = arith.constant 14 : i32
    %69 = vector.broadcast %c14_i32 : i32 to vector<1x256xi32>
    %70 = arith.cmpi sle, %66, %69 : vector<1x256xi32>
    %cst_32 = arith.constant 0.000000e+00 : f32
    %71 = vector.broadcast %cst_32 : f32 to vector<16x256xf32>
    %c0_33 = arith.constant 0 : index
    %c0_34 = arith.constant 0 : index
    %72 = vector.load %arg11[%c0_33, %c0_34] : memref<16x290xf32, #tpu.memory_space<vmem>>, vector<16x256xf32>
    %cst_35 = arith.constant 0.000000e+00 : f32
    %73 = vector.shape_cast %68 : vector<1x256xi1> to vector<1x256xi1>
    %74 = vector.broadcast %73 : vector<1x256xi1> to vector<16x256xi1>
    %75 = vector.broadcast %cst_35 : f32 to vector<16x256xf32>
    %76 = arith.select %74, %72, %75 : vector<16x256xi1>, vector<16x256xf32>
    %c0_36 = arith.constant 0 : index
    %c0_37 = arith.constant 0 : index
    %77 = vector.load %arg3[%c0_36, %c0_37] : memref<16x9xf32, #tpu.memory_space<vmem>>, vector<16x1xf32>
    %78 = vector.broadcast %77 : vector<16x1xf32> to vector<16x256xf32>
    %79 = arith.mulf %78, %76 : vector<16x256xf32>
    %80 = arith.addf %71, %79 : vector<16x256xf32>
    %c0_38 = arith.constant 0 : index
    %c1 = arith.constant 1 : index
    %81 = vector.load %arg11[%c0_38, %c1] : memref<16x290xf32, #tpu.memory_space<vmem>>, vector<16x256xf32>
    %c0_39 = arith.constant 0 : index
    %c1_40 = arith.constant 1 : index
    %82 = vector.load %arg3[%c0_39, %c1_40] : memref<16x9xf32, #tpu.memory_space<vmem>>, vector<16x1xf32>
    %83 = vector.broadcast %82 : vector<16x1xf32> to vector<16x256xf32>
    %84 = arith.mulf %83, %81 : vector<16x256xf32>
    %85 = arith.addf %80, %84 : vector<16x256xf32>
    %c0_41 = arith.constant 0 : index
    %c2 = arith.constant 2 : index
    %86 = vector.load %arg11[%c0_41, %c2] : memref<16x290xf32, #tpu.memory_space<vmem>>, vector<16x256xf32>
    %cst_42 = arith.constant 0.000000e+00 : f32
    %87 = vector.shape_cast %70 : vector<1x256xi1> to vector<1x256xi1>
    %88 = vector.broadcast %87 : vector<1x256xi1> to vector<16x256xi1>
    %89 = vector.broadcast %cst_42 : f32 to vector<16x256xf32>
    %90 = arith.select %88, %86, %89 : vector<16x256xi1>, vector<16x256xf32>
    %c0_43 = arith.constant 0 : index
    %c2_44 = arith.constant 2 : index
    %91 = vector.load %arg3[%c0_43, %c2_44] : memref<16x9xf32, #tpu.memory_space<vmem>>, vector<16x1xf32>
    %92 = vector.broadcast %91 : vector<16x1xf32> to vector<16x256xf32>
    %93 = arith.mulf %92, %90 : vector<16x256xf32>
    %94 = arith.addf %85, %93 : vector<16x256xf32>
    %c0_45 = arith.constant 0 : index
    %c16 = arith.constant 16 : index
    %95 = vector.load %arg11[%c0_45, %c16] : memref<16x290xf32, #tpu.memory_space<vmem>>, vector<16x256xf32>
    %cst_46 = arith.constant 0.000000e+00 : f32
    %96 = vector.shape_cast %68 : vector<1x256xi1> to vector<1x256xi1>
    %97 = vector.broadcast %96 : vector<1x256xi1> to vector<16x256xi1>
    %98 = vector.broadcast %cst_46 : f32 to vector<16x256xf32>
    %99 = arith.select %97, %95, %98 : vector<16x256xi1>, vector<16x256xf32>
    %c0_47 = arith.constant 0 : index
    %c3 = arith.constant 3 : index
    %100 = vector.load %arg3[%c0_47, %c3] : memref<16x9xf32, #tpu.memory_space<vmem>>, vector<16x1xf32>
    %101 = vector.broadcast %100 : vector<16x1xf32> to vector<16x256xf32>
    %102 = arith.mulf %101, %99 : vector<16x256xf32>
    %103 = arith.addf %94, %102 : vector<16x256xf32>
    %c0_48 = arith.constant 0 : index
    %c17_49 = arith.constant 17 : index
    %104 = vector.load %arg11[%c0_48, %c17_49] : memref<16x290xf32, #tpu.memory_space<vmem>>, vector<16x256xf32>
    %c0_50 = arith.constant 0 : index
    %c4 = arith.constant 4 : index
    %105 = vector.load %arg3[%c0_50, %c4] : memref<16x9xf32, #tpu.memory_space<vmem>>, vector<16x1xf32>
    %106 = vector.broadcast %105 : vector<16x1xf32> to vector<16x256xf32>
    %107 = arith.mulf %106, %104 : vector<16x256xf32>
    %108 = arith.addf %103, %107 : vector<16x256xf32>
    %c0_51 = arith.constant 0 : index
    %c18 = arith.constant 18 : index
    %109 = vector.load %arg11[%c0_51, %c18] : memref<16x290xf32, #tpu.memory_space<vmem>>, vector<16x256xf32>
    %cst_52 = arith.constant 0.000000e+00 : f32
    %110 = vector.shape_cast %70 : vector<1x256xi1> to vector<1x256xi1>
    %111 = vector.broadcast %110 : vector<1x256xi1> to vector<16x256xi1>
    %112 = vector.broadcast %cst_52 : f32 to vector<16x256xf32>
    %113 = arith.select %111, %109, %112 : vector<16x256xi1>, vector<16x256xf32>
    %c0_53 = arith.constant 0 : index
    %c5 = arith.constant 5 : index
    %114 = vector.load %arg3[%c0_53, %c5] : memref<16x9xf32, #tpu.memory_space<vmem>>, vector<16x1xf32>
    %115 = vector.broadcast %114 : vector<16x1xf32> to vector<16x256xf32>
    %116 = arith.mulf %115, %113 : vector<16x256xf32>
    %117 = arith.addf %108, %116 : vector<16x256xf32>
    %c0_54 = arith.constant 0 : index
    %c32 = arith.constant 32 : index
    %118 = vector.load %arg11[%c0_54, %c32] : memref<16x290xf32, #tpu.memory_space<vmem>>, vector<16x256xf32>
    %cst_55 = arith.constant 0.000000e+00 : f32
    %119 = vector.shape_cast %68 : vector<1x256xi1> to vector<1x256xi1>
    %120 = vector.broadcast %119 : vector<1x256xi1> to vector<16x256xi1>
    %121 = vector.broadcast %cst_55 : f32 to vector<16x256xf32>
    %122 = arith.select %120, %118, %121 : vector<16x256xi1>, vector<16x256xf32>
    %c0_56 = arith.constant 0 : index
    %c6 = arith.constant 6 : index
    %123 = vector.load %arg3[%c0_56, %c6] : memref<16x9xf32, #tpu.memory_space<vmem>>, vector<16x1xf32>
    %124 = vector.broadcast %123 : vector<16x1xf32> to vector<16x256xf32>
    %125 = arith.mulf %124, %122 : vector<16x256xf32>
    %126 = arith.addf %117, %125 : vector<16x256xf32>
    %c0_57 = arith.constant 0 : index
    %c33 = arith.constant 33 : index
    %127 = vector.load %arg11[%c0_57, %c33] : memref<16x290xf32, #tpu.memory_space<vmem>>, vector<16x256xf32>
    %c0_58 = arith.constant 0 : index
    %c7 = arith.constant 7 : index
    %128 = vector.load %arg3[%c0_58, %c7] : memref<16x9xf32, #tpu.memory_space<vmem>>, vector<16x1xf32>
    %129 = vector.broadcast %128 : vector<16x1xf32> to vector<16x256xf32>
    %130 = arith.mulf %129, %127 : vector<16x256xf32>
    %131 = arith.addf %126, %130 : vector<16x256xf32>
    %c0_59 = arith.constant 0 : index
    %c34 = arith.constant 34 : index
    %132 = vector.load %arg11[%c0_59, %c34] : memref<16x290xf32, #tpu.memory_space<vmem>>, vector<16x256xf32>
    %cst_60 = arith.constant 0.000000e+00 : f32
    %133 = vector.shape_cast %70 : vector<1x256xi1> to vector<1x256xi1>
    %134 = vector.broadcast %133 : vector<1x256xi1> to vector<16x256xi1>
    %135 = vector.broadcast %cst_60 : f32 to vector<16x256xf32>
    %136 = arith.select %134, %132, %135 : vector<16x256xi1>, vector<16x256xf32>
    %c0_61 = arith.constant 0 : index
    %c8 = arith.constant 8 : index
    %137 = vector.load %arg3[%c0_61, %c8] : memref<16x9xf32, #tpu.memory_space<vmem>>, vector<16x1xf32>
    %138 = vector.broadcast %137 : vector<16x1xf32> to vector<16x256xf32>
    %139 = arith.mulf %138, %136 : vector<16x256xf32>
    %140 = arith.addf %131, %139 : vector<16x256xf32>
    %c0_62 = arith.constant 0 : index
    %c0_63 = arith.constant 0 : index
    %141 = vector.load %arg4[%c0_62, %c0_63] : memref<16x1xf32, #tpu.memory_space<vmem>>, vector<16x1xf32>
    %142 = vector.broadcast %141 : vector<16x1xf32> to vector<16x256xf32>
    %143 = arith.addf %140, %142 : vector<16x256xf32>
    %144 = arith.mulf %143, %45 : vector<16x256xf32>
    %145 = arith.addf %144, %1 : vector<16x256xf32>
    %c0_64 = arith.constant 0 : index
    %c0_65 = arith.constant 0 : index
    %c0_66 = arith.constant 0 : index
    %146 = vector.load %arg10[%c0_64, %c0_65, %c0_66] : memref<1x16x256xf32, #tpu.memory_space<vmem>>, vector<1x16x256xf32>
    %147 = vector.shape_cast %146 : vector<1x16x256xf32> to vector<16x256xf32>
    %148 = vector.shape_cast %145 : vector<16x256xf32> to vector<1x16x256xf32>
    tpu.vector_store %arg10[%c0_64, %c0_65, %c0_66], %148 {strides = array<i32>} : memref<1x16x256xf32, #tpu.memory_space<vmem>>, vector<1x16x256xf32>,
    return
  }
  func.func @transform_0(%arg0: i32) -> (i32, i32) {
    %c0_i32 = arith.constant 0 : i32
    %c0_i32_0 = arith.constant 0 : i32
    %c0_i32_1 = arith.constant 0 : i32
    return %c0_i32, %c0_i32_0 : i32, i32
  }
  func.func @transform_1(%arg0: i32) -> (i32, i32) {
    %c0_i32 = arith.constant 0 : i32
    %c0_i32_0 = arith.constant 0 : i32
    %c0_i32_1 = arith.constant 0 : i32
    return %c0_i32, %c0_i32_0 : i32, i32
  }
  func.func @transform_2(%arg0: i32) -> (i32, i32) {
    %c0_i32 = arith.constant 0 : i32
    %c0_i32_0 = arith.constant 0 : i32
    %c0_i32_1 = arith.constant 0 : i32
    return %c0_i32, %c0_i32_0 : i32, i32
  }
  func.func @transform_3(%arg0: i32) -> (i32, i32) {
    %c0_i32 = arith.constant 0 : i32
    %c0_i32_0 = arith.constant 0 : i32
    %c0_i32_1 = arith.constant 0 : i32
    return %c0_i32, %c0_i32_0 : i32, i32
  }
  func.func @transform_4(%arg0: i32) -> (i32, i32) {
    %c0_i32 = arith.constant 0 : i32
    %c0_i32_0 = arith.constant 0 : i32
    %c0_i32_1 = arith.constant 0 : i32
    return %c0_i32, %c0_i32_0 : i32, i32
  }
  func.func @transform_5(%arg0: i32) -> (i32, i32) {
    %c0_i32 = arith.constant 0 : i32
    %c0_i32_0 = arith.constant 0 : i32
    %c0_i32_1 = arith.constant 0 : i32
    return %c0_i32, %c0_i32_0 : i32, i32
  }
  func.func @transform_6(%arg0: i32) -> (i32, i32) {
    %c0_i32 = arith.constant 0 : i32
    %c0_i32_0 = arith.constant 0 : i32
    %c0_i32_1 = arith.constant 0 : i32
    return %c0_i32, %c0_i32_0 : i32, i32
  }
  func.func @transform_7(%arg0: i32) -> (i32, i32) {
    %c0_i32 = arith.constant 0 : i32
    %c0_i32_0 = arith.constant 0 : i32
    %c0_i32_1 = arith.constant 0 : i32
    return %c0_i32, %c0_i32_0 : i32, i32
  }
  func.func @transform_8(%arg0: i32) -> (i32, i32, i32) {
    %c0_i32 = arith.constant 0 : i32
    %c0_i32_0 = arith.constant 0 : i32
    %c0_i32_1 = arith.constant 0 : i32
    return %arg0, %c0_i32, %c0_i32_0 : i32, i32, i32
  }
  func.func @transform_9(%arg0: i32) -> (i32, i32, i32) {
    %c0_i32 = arith.constant 0 : i32
    %c0_i32_0 = arith.constant 0 : i32
    %c0_i32_1 = arith.constant 0 : i32
    return %arg0, %c0_i32, %c0_i32_0 : i32, i32, i32
  }
}

</mosaic_0001>

<bundles_post_ra>
// kernel: tpu_custom_call.1
= control target key start
LH: loop header
LB: loop body
LE: loop exit
PB: predicated region body
PF: predicated region fallthrough
CT: control target
= control target key end

     0   :  { %s1866_s0 = inlined_call_operand.vmem [shape: f32[16,1], index: 0, kind: input, shape index: {}]   ;;  %s1867_s1 = inlined_call_operand.vmem [shape: f32[16,1], index: 1, kind: input, shape index: {}]   ;;  %s1868_s2 = inlined_call_operand.vmem [shape: f32[16,9], index: 2, kind: input, shape index: {}]   ;;  %s1869_s3 = inlined_call_operand.vmem [shape: f32[16,1], index: 3, kind: input, shape index: {}]   ;;  %s1870_s4 = inlined_call_operand.vmem [shape: f32[16,1], index: 4, kind: input, shape index: {}]   ;;  %s1871_s5 = inlined_call_operand.<no memory space> [shape: f32[1,1], index: 5, kind: input, shape index: {}]   ;;  %s1872_s6 = inlined_call_operand.vmem [shape: f32[16,1], index: 6, kind: input, shape index: {}]   ;;  %s1873_s7 = inlined_call_operand.vmem [shape: f32[16,1], index: 7, kind: input, shape index: {}]   ;;  %s1874_s8 = inlined_call_operand.vmem [shape: f32[2,16,256], index: 8, kind: input, shape index: {}]   ;;  %s1875_s9 = inlined_call_operand.hbm [shape: f32[2,16,256], index: 9, kind: output, shape index: {}]  }
   0x1   :  { %v14_v0 = vstv %s1871_s5 }
   0x2   :  { %15 = vst [vmem:[#allocation3] sm:$0x1] %v14_v0 }
   0x3   :  { %16 = vsyncpa [#allocation5], 0 }
   0x4   :  { %18 = vsyncpa [#allocation5 + $0x1], 0  ;;  %s1270_s11 = smov 0   ;;  %s1272_s12 = smov 0  }
   0x5   :  { %s1274_s13 = smov 0   ;;  %s1276_s14 = smov 0  }
   0x6 LB: > { %s1291_s5 = sadd.s32 4294967295, %s1193_s14   ;;  %s1029_s15 = sadd.s32 4294967294, %s1193_s14   ;;  %s1193_s14 = sphi %s1276_s14, %s1925_s14   ;;  %s1189_s13 = sphi %s1274_s13, %s1924_s13   ;;  %s1185_s12 = sphi %s1272_s12, %s1923_s12   ;;  %s1181_s11 = sphi %s1270_s11, %s1922_s11  }
   0x7   : > { %s1295_s16 = sadd.s32 1, %s1193_s14   ;;  %s225_s17 = sadd.s32 1, %s1189_s13 }
   0x8   : > { %s222_s18 = ssub.s32 %s1193_s14, %s1295_s16  ;;  %p235_p0 = scmp.ne.s32.totalorder %s1189_s13, %s1185_s12 }
   0x9   : > { %p223_p1 = scmp.eq.s32.totalorder %s222_s18, 0  ;;  %p236_p2 = scmp.eq.s32.totalorder %s1291_s5, 1 }
   0xa   : > { %p241_p3 = scmp.ne.s32.totalorder %s1185_s12, %s1181_s11  ;;  %p242_p4 = scmp.eq.s32.totalorder %s1029_s15, 1 }
   0xb   : > { %s1306_s19 = scalar_select %p223_p1, %s1189_s13, %s225_s17  }
   0xc   : > { %p1308_p5 = por %p236_p2, %p235_p0  ;;  %p1312_p6 = por %p242_p4, %p241_p3 }
   0xd   : > { %p1032_p7 = scmp.ge.s32.totalorder %s1193_s14, 1  ;;  %p292_p8 = scmp.lt.s32.totalorder %s1193_s14, 3 }
   0xf   : > { %p293_p9 = pnand %p1032_p7, %p292_p8 }
  0x11   : > { %296 = sbr.rel (%p293_p9) target bundleno = 548 (0x224), region = 56 }
  0x18   : > { %v402_v1 = vld [vmem:[%s1867_s1] sm:$0xff]  ;;  %v1195_v3 = vmov 0   ;;  %v403_v4 = vld [vmem:[%s1867_s1 + $0x8] sm:$0xff]  ;;  %v1196_v8 = vmov 1   ;;  %v1197_v9 = vmov 4   ;;  %p328_p10 = scmp.lt.s32.totalorder %s1291_s5, 1 }
  0x19   : > { %v386_v2 = vld [vmem:[%s1866_s0] sm:$0xff]  ;;  %1104 = vset.pattern.permute.xlu1 %v1195_v3  ;;  %1103 = vset.pattern.permute.xlu0 %v1195_v3  ;;  %v387_v5 = vld [vmem:[%s1866_s0 + $0x8] sm:$0xff]  ;;  %v1198_v10 = vmov 7   ;;  %v1199_v11 = vmov 2   ;;  %v1200_v12 = vmov 3   ;;  %v1201_v17 = vmov 5  }
  0x1a   : > { %406 = vperm.xlu1 %1104, %v402_v1   ;;  %390 = vperm.xlu0 %1103, %v386_v2   ;;  %v550_v6 = vld [vmem:[%s1868_s2 + $0x8] sm:$0xff]  ;;  %v549_v7 = vld [vmem:[%s1868_s2] sm:$0xff]  ;;  %s329_s18 = scalar_select %p328_p10, %s1291_s5, 1  ;;  %v1202_v20 = vmov 6   ;;  %v1203_v24 = vmov 8   ;;  %vm473_vm0 = vcmask 138240  }
  0x1b   : > { %v925_v28 = vld [vmem:[%s1869_s3] sm:$0xff]  ;;  %v926_v29 = vld [vmem:[%s1869_s3 + $0x8] sm:$0xff]  ;;  %vm476_vm1 = vcmask 277640   ;;  %v1204_v32 = vmov 0.0   ;;  %s1205_s30 = smov 17   ;;  %vm499_vm2 = vcmask 1047688  }
  0x1c   : > { %s1041_s22 = sshll.u32 %s329_s18, 5  ;;  %477 = vst.msk [vmem:[#allocation2 + $0x10] sm:$0xff] %vm476_vm1, %v1204_v32  ;;  %478 = vst.msk [vmem:[#allocation2 + $0x28] sm:$0xff] %vm476_vm1, %v1204_v32  ;;  %s1206_s10 = smov 126   ;;  %vm430_vm3 = vcmask 7168   ;;  %vm642_vm4 = vcmask 1031168  }
  0x1d   : > { %s332_s25 = scalar_lea.vmem %s1874_s8, %s1041_s22  ;;  %474 = vst.msk [vmem:[#allocation2] sm:$0xff] %vm473_vm0, %v1204_v32  ;;  %475 = vst.msk [vmem:[#allocation2 + $0x18] sm:$0xff] %vm473_vm0, %v1204_v32  ;;  %s1207_s15 = smov 112   ;;  %vm683_vm7 = vcmask 916480   ;;  %vm607_vm8 = vcmask 1039360   ;;  %vm769_vm10 = vcmask 900096  }
  0x1e   : > { %411 = vperm.xlu1 %1104, %v403_v4   ;;  %395 = vperm.xlu0 %1103, %v387_v5   ;;  %v1343_v13 = vld [vmem:[%s332_s25] sm:$0xff]  ;;  %v1345_v14 = vld [vmem:[%s332_s25 + $0x10] sm:$0xff]  ;;  %v1347_v15 = vld [vmem:[%s332_s25 + $0x8] sm:$0xff]  ;;  %s1208_s17 = smov 110   ;;  %s1209_s18 = smov 96   ;;  %vm744_vm12 = vcmask 908288  }
  0x1f   : > { %1888 = vst [vmem:[#allocation7_spill] sm:$0xff] %v1343_v13  ;;  %1889 = vst [vmem:[#allocation8_spill] sm:$0xff] %v1345_v14  ;;  %v1349_v16 = vld [vmem:[%s332_s25 + $0x18] sm:$0xff]  ;;  %v337_v18 = vadd.f32 %v1345_v14, %v1343_v13  ;;  %s1210_s22 = smov 94   ;;  %s1211_s23 = smov 127   ;;  %vm810_vm13 = vcmask 785408  }
  0x20   : > { %1890 = vst [vmem:[#allocation9_spill] sm:$0xff] %v1347_v15  ;;  %1891 = vst [vmem:[#allocation10_spill] sm:$0xff] %v1349_v16  ;;  %v344_v19 = vadd.f32 %v1349_v16, %v1347_v15  ;;  %s1212_s26 = smov 111   ;;  %s1213_s29 = smov 95   ;;  %vm896_vm14 = vcmask 769024   ;;  %vm871_vm15 = vcmask 777216  }
  0x21   : > { %v338_v21 = vrot.slane %v337_v18, 4  ;;  %s1042_s28 = sshll.u32 %s1291_s5, 9 }
  0x22   : > { %558 = vperm.xlu1 %1104, %v550_v6   ;;  %1105 = vset.pattern.permute.xlu0 %v1196_v8  ;;  %v345_v22 = vrot.slane %v344_v19, 4 }
  0x23   : > { %576 = vperm.xlu0 %1105, %v549_v7   ;;  %v339_v23 = vadd.f32 %v338_v21, %v337_v18 }
  0x24   : > { %v346_v25 = vadd.f32 %v345_v22, %v344_v19 }
  0x25   : > { %v340_v26 = vrot.slane %v339_v23, 2 }
  0x26   : > { %1106 = vset.pattern.permute.xlu1 %v1196_v8  ;;  %v347_v27 = vrot.slane %v346_v25, 2 }
  0x27   : > { %1107 = vset.pattern.permute.xlu0 %v1197_v9  ;;  %580 = vperm.xlu1 %1106, %v550_v6   ;;  %v341_v30 = vadd.f32 %v340_v26, %v339_v23 }
  0x28   : > { %713 = vperm.xlu0 %1107, %v549_v7   ;;  %v348_v31 = vadd.f32 %v347_v27, %v346_v25 }
  0x29   : > { %v342_v33 = vrot.slane %v341_v30, 1 }
  0x2a   : > { %v349_v34 = vrot.slane %v348_v31, 1 }
  0x2b   : > { %1108 = vset.pattern.permute.xlu1 %v1197_v9  ;;  %v343_v35 = vadd.f32 %v342_v33, %v341_v30 }
  0x2c   : > { %1110 = vset.pattern.permute.xlu0 %v1198_v10  ;;  %717 = vperm.xlu1 %1108, %v550_v6   ;;  %v350_v36 = vadd.f32 %v349_v34, %v348_v31 }
  0x2d   : > { %844 = vperm.xlu0 %1110, %v550_v6   ;;  %v352_v37 = vmul.f32 0.0625, %v343_v35 }
  0x2e   : > { %v353_v38 = vmul.f32 0.0625, %v350_v36 }
  0x2f   : > { %v354_v39 = vsub.f32 %v1343_v13, %v352_v37  ;;  %v356_v40 = vsub.f32 %v1345_v14, %v352_v37 }
  0x30   : > { %1109 = vset.pattern.permute.xlu1 %v1198_v10  ;;  %v355_v41 = vsub.f32 %v1347_v15, %v353_v38  ;;  %v357_v42 = vsub.f32 %v1349_v16, %v353_v38 }
  0x31   : > { %1112 = vset.pattern.permute.xlu0 %v1199_v11  ;;  %840 = vperm.xlu1 %1109, %v549_v7   ;;  %v358_v43 = vmul.f32 %v354_v39, %v354_v39  ;;  %v360_v44 = vmul.f32 %v356_v40, %v356_v40 }
  0x32   : > { %660 = vperm.xlu0 %1112, %v550_v6   ;;  %v359_v45 = vmul.f32 %v355_v41, %v355_v41  ;;  %v361_v46 = vmul.f32 %v357_v42, %v357_v42 }
  0x33   : > { %v362_v47 = vadd.f32 %v360_v44, %v358_v43 }
  0x34   : > { %v369_v48 = vadd.f32 %v361_v46, %v359_v45 }
  0x35   : > { %1111 = vset.pattern.permute.xlu1 %v1199_v11  ;;  %v363_v49 = vrot.slane %v362_v47, 4 }
  0x36   : > { %1113 = vset.pattern.permute.xlu0 %v1200_v12  ;;  %656 = vperm.xlu1 %1111, %v549_v7   ;;  %v370_v50 = vrot.slane %v369_v48, 4 }
  0x37   : > { %697 = vperm.xlu0 %1113, %v549_v7   ;;  %v364_v51 = vadd.f32 %v363_v49, %v362_v47 }
  0x38   : > { %v371_v52 = vadd.f32 %v370_v50, %v369_v48 }
  0x39   : > { %v365_v53 = vrot.slane %v364_v51, 2 }
  0x3a   : > { %1114 = vset.pattern.permute.xlu1 %v1200_v12  ;;  %v372_v54 = vrot.slane %v371_v52, 2 }
  0x3b   : > { %1115 = vset.pattern.permute.xlu0 %v1201_v17  ;;  %701 = vperm.xlu1 %1114, %v550_v6   ;;  %v366_v55 = vadd.f32 %v365_v53, %v364_v51 }
  0x3c   : > { %783 = vperm.xlu0 %1115, %v549_v7   ;;  %v373_v56 = vadd.f32 %v372_v54, %v371_v52 }
  0x3d   : > { %v367_v57 = vrot.slane %v366_v55, 1 }
  0x3e   : > { %v374_v58 = vrot.slane %v373_v56, 1 }
  0x3f   : > { %1116 = vset.pattern.permute.xlu1 %v1201_v17  ;;  %v368_v59 = vadd.f32 %v367_v57, %v366_v55 }
  0x40   : > { %1118 = vset.pattern.permute.xlu0 %v1202_v20  ;;  %787 = vperm.xlu1 %1116, %v550_v6   ;;  %v375_v60 = vadd.f32 %v374_v58, %v373_v56 }
  0x41   : > { %828 = vperm.xlu0 %1118, %v550_v6   ;;  %v376_v61 = vmul.f32 0.0625, %v368_v59 }
  0x42   : > { %v377_v62 = vmul.f32 0.0625, %v375_v60  ;;  %v426_v60 = vld [vmem:[%s1870_s4] sm:$0xff] }
  0x43   : > { %v378_v63 = vadd.f32 1e-05, %v376_v61  ;;  %v427_v61 = vld [vmem:[%s1870_s4 + $0x8] sm:$0xff] }
  0x44   : > { %1117 = vset.pattern.permute.xlu1 %v1202_v20  ;;  %v379_v0 = vadd.f32 1e-05, %v377_v62 }
  0x45   : > { %1120 = vset.pattern.permute.xlu0 %v1203_v24  ;;  %824 = vperm.xlu1 %1117, %v549_v7   ;;  %1123 = vrsqrt.f32 %v378_v63 }
  0x46   : > { %914 = vperm.xlu0 %1120, %v550_v6   ;;  %1125 = vrsqrt.f32 %v379_v0 }
  0x49   : > { %1119 = vset.pattern.permute.xlu1 %v1203_v24 }
  0x4a   : > { %1121 = vset.pattern.permute.xlu0 %v1195_v3  ;;  %910 = vperm.xlu1 %1119, %v549_v7  }
  0x4b   : > { %553 = vperm.xlu0 %1121, %v549_v7  }
  0x4e   : > { %1122 = vset.pattern.permute.xlu1 %v1195_v3 }
  0x4f   : > { %929 = vperm.xlu0 %1121, %v925_v28   ;;  %934 = vperm.xlu1 %1122, %v926_v29   ;;  %v1124_v1 = vpop.eup %1123 }
  0x50   : > { %v1126_v2 = vpop.eup %1125  ;;  %v382_v3 = vmul.f32 %v1124_v1, %v354_v39  ;;  %v384_v9 = vmul.f32 %v1124_v1, %v356_v40 }
  0x51   : > { %v383_v4 = vmul.f32 %v1126_v2, %v355_v41  ;;  %v385_v10 = vmul.f32 %v1126_v2, %v357_v42 }
  0x99   : > { %v407_v5 = vpop.permute.xlu1 %406  ;;  %v391_v6 = vpop.permute.xlu0 %390 }
  0x9a   : > { %v398_v7 = vmul.f32 %v391_v6, %v382_v3  ;;  %v399_v8 = vmul.f32 %v391_v6, %v383_v4 }
  0x9c   : > { %v1369_v11 = vadd.f32 %v407_v5, %v398_v7  ;;  %v1371_v12 = vadd.f32 %v407_v5, %v399_v8 }
  0x9d   : > { %v396_v17 = vpop.permute.xlu0 %395  ;;  %v412_v20 = vpop.permute.xlu1 %411 }
  0x9e   : > { %1892 = vst [vmem:[#allocation11_spill] sm:$0xff] %v1371_v12  ;;  %v400_v18 = vmul.f32 %v396_v17, %v384_v9  ;;  %v401_v19 = vmul.f32 %v396_v17, %v385_v10  ;;  %485 = vrot.lane.b32.xlu1 %v1371_v12, %s1205_s30  ;;  %483 = vrot.lane.b32.xlu0 %v1369_v11, %s1205_s30 }
  0x9f   : > { %v418_v23 = vadd.f32 %v1371_v12, %v1369_v11 }
  0xa0   : > { %v1375_v21 = vadd.f32 %v412_v20, %v400_v18  ;;  %v1377_v22 = vadd.f32 %v412_v20, %v401_v19  ;;  %v445_v18 = vlaneseq }
  0xa1   : > { %v1385_v25 = vpop.permute.xlu1 %558 }
  0xa2   : > { %1893 = vst [vmem:[#allocation12_spill] sm:$0xff] %v1375_v21  ;;  %1894 = vst [vmem:[#allocation13_spill] sm:$0xff] %v1377_v22  ;;  %489 = vrot.lane.b32.xlu1 %v1377_v22, %s1205_s30  ;;  %487 = vrot.lane.b32.xlu0 %v1375_v21, %s1205_s30  ;;  %v421_v24 = vadd.f32 %v1377_v22, %v1375_v21  ;;  %v1387_v26 = vpop.permute.xlu0 %576  ;;  %v446_v20 = vshrl.u32 %v445_v18, 7 }
  0xa6   : > { %v1389_v27 = vpop.permute.xlu1 %580 }
  0xa7   : > { %v1391_v28 = vpop.permute.xlu0 %713 }
  0xab   : > { %v1393_v29 = vpop.permute.xlu1 %717 }
  0xac   : > { %v1395_v30 = vpop.permute.xlu0 %844 }
  0xb0   : > { %v1397_v31 = vpop.permute.xlu1 %840 }
  0xb1   : > { %v1399_v32 = vpop.permute.xlu0 %660 }
  0xb5   : > { %v1401_v33 = vpop.permute.xlu1 %656 }
  0xb6   : > { %v1403_v34 = vpop.permute.xlu0 %697 }
  0xba   : > { %v1405_v35 = vpop.permute.xlu1 %701 }
  0xbb   : > { %v1407_v36 = vpop.permute.xlu0 %783 }
  0xbf   : > { %v1409_v37 = vpop.permute.xlu1 %787 }
  0xc0   : > { %v1411_v38 = vpop.permute.xlu0 %828 }
  0xc1   : > { %419 = vadd.xlane.f32.xlu0 %v418_v23 }
  0xc4   : > { %v1413_v39 = vpop.permute.xlu1 %824 }
  0xc5   : > { %v1415_v40 = vpop.permute.xlu0 %914 }
  0xc6   : > { %422 = vadd.xlane.f32.xlu1 %v421_v24  ;;  %1895 = vst [vmem:[#allocation14_spill] sm:$0xff] %v1415_v40 }
  0xc9   : > { %v1417_v41 = vpop.permute.xlu1 %910 }
  0xca   : > { %v1419_v42 = vpop.permute.xlu0 %553 }
  0xce   : > { %v1421_v43 = vpop.permute.xlu1 %934  ;;  %v1423_v44 = vpop.permute.xlu0 %929 }
  0xcf   : > { %1896 = vst [vmem:[#allocation15_spill] sm:$0xff] %v1421_v43 }
 0x110   : > { %v486_v45 = vpop.permute.xlu1 %485  ;;  %v484_v46 = vpop.permute.xlu0 %483 }
 0x111   : > { %502 = vst.msk [vmem:[#allocation2 + $0x10] sm:$0xff] %vm473_vm0, %v486_v45  ;;  %v1427_v47 = vsel %vm473_vm0, %v484_v46, %v486_v45 }
 0x112   : > { %500 = vst.msk [vmem:[#allocation2] sm:$0xff] %vm499_vm2, %v484_v46  ;;  %v584_v8 = vmul.f32 %v1387_v26, %v1427_v47  ;;  %v721_v17 = vmul.f32 %v1391_v28, %v1427_v47  ;;  %v848_v45 = vmul.f32 %v1397_v31, %v1427_v47  ;;  %v440_v46 = vld [vmem:[#allocation3] sm:$0x1] }
 0x114   : > { %v490_v48 = vpop.permute.xlu1 %489  ;;  %v488_v49 = vpop.permute.xlu0 %487 }
 0x115   : > { %505 = vst.msk [vmem:[#allocation2 + $0x28] sm:$0xff] %vm473_vm0, %v490_v48  ;;  %v1431_v50 = vsel %vm473_vm0, %v488_v49, %v490_v48 }
 0x116   : > { %503 = vst.msk [vmem:[#allocation2 + $0x18] sm:$0xff] %vm499_vm2, %v488_v49  ;;  %v447_v49 = vsub.s32 0, %v446_v20 }
 0x118   : > { %v1437_v52 = vld [vmem:[#allocation2 + $0x10] sm:$0xff] }
 0x119   : > { %v1433_v51 = vld [vmem:[#allocation2] sm:$0xff] }
 0x11a   : > { %630 = vrot.lane.b32.xlu1 %v1433_v51, %s1206_s10  ;;  %v583_v24 = vmul.f32 %v1387_v26, %v1433_v51 }
 0x11c   : > { %v1439_v53 = vld [vmem:[#allocation2 + $0x28] sm:$0xff] }
 0x11d   : > { %640 = vrot.lane.b32.xlu0 %v1439_v53, %s1206_s10  ;;  %v1445_v54 = vld [vmem:[#allocation2 + $0x18] sm:$0xff]  ;;  %v588_v56 = vmul.f32 %v1389_v27, %v1439_v53  ;;  %v725_v63 = vmul.f32 %v1393_v29, %v1439_v53 }
 0x11e   : > { %634 = vrot.lane.b32.xlu1 %v1437_v52, %s1206_s10  ;;  %v586_v55 = vmul.f32 %v1389_v27, %v1445_v54  ;;  %v723_v58 = vmul.f32 %v1393_v29, %v1445_v54  ;;  %v850_v3 = vmul.f32 %v1395_v30, %v1445_v54 }
 0x121   : > { %675 = vrot.lane.b32.xlu0 %v1437_v52, %s1207_s15 }
 0x122   : > { %636 = vrot.lane.b32.xlu1 %v1445_v54, %s1206_s10 }
 0x125   : > { %761 = vrot.lane.b32.xlu0 %v1437_v52, %s1208_s17 }
 0x126   : > { %671 = vrot.lane.b32.xlu1 %v1433_v51, %s1207_s15 }
 0x129   : > { %802 = vrot.lane.b32.xlu0 %v1437_v52, %s1209_s18 }
 0x12a   : > { %677 = vrot.lane.b32.xlu1 %v1445_v54, %s1207_s15 }
 0x12d   : > { %890 = vrot.lane.b32.xlu0 %v1445_v54, %s1210_s22 }
 0x12e   : > { %681 = vrot.lane.b32.xlu1 %v1439_v53, %s1207_s15 }
 0x131   : > { %894 = vrot.lane.b32.xlu0 %v1439_v53, %s1210_s22 }
 0x132   : > { %757 = vrot.lane.b32.xlu1 %v1433_v51, %s1208_s17 }
 0x135   : > { %632 = vrot.lane.b32.xlu0 %v1427_v47, %s1206_s10 }
 0x136   : > { %763 = vrot.lane.b32.xlu1 %v1445_v54, %s1208_s17 }
 0x139   : > { %679 = vrot.lane.b32.xlu0 %v1431_v50, %s1207_s15 }
 0x13a   : > { %767 = vrot.lane.b32.xlu1 %v1439_v53, %s1208_s17 }
 0x13d   : > { %765 = vrot.lane.b32.xlu0 %v1431_v50, %s1208_s17 }
 0x13e   : > { %798 = vrot.lane.b32.xlu1 %v1433_v51, %s1209_s18 }
 0x141   : > { %806 = vrot.lane.b32.xlu0 %v1431_v50, %s1209_s18 }
 0x142   : > { %804 = vrot.lane.b32.xlu1 %v1445_v54, %s1209_s18 }
 0x145   : > { %886 = vrot.lane.b32.xlu0 %v1427_v47, %s1210_s22 }
 0x146   : > { %808 = vrot.lane.b32.xlu1 %v1439_v53, %s1209_s18 }
 0x149   : > { %601 = vrot.lane.b32.xlu0 %v586_v55, %s1211_s23 }
 0x14a   : > { %884 = vrot.lane.b32.xlu1 %v1433_v51, %s1210_s22 }
 0x14d   : > { %605 = vrot.lane.b32.xlu0 %v588_v56, %s1211_s23  ;;  %v585_v56 = vmul.f32 %v1387_v26, %v1437_v52  ;;  %v444_v26 = vld [vmem:[%s1872_s6 + $0x8] sm:$0xff] }
 0x14e   : > { %888 = vrot.lane.b32.xlu1 %v1437_v52, %s1210_s22  ;;  %v420_v57 = vpop.xlane.xlu0 %419 }
 0x14f   : > { %v424_v59 = vmul.f32 0.00390625, %v420_v57 }
 0x151   : > { %738 = vrot.lane.b32.xlu0 %v723_v58, %s1212_s26  ;;  %v428_v0 = vmul.f32 %v426_v60, %v424_v59  ;;  %v443_v58 = vld [vmem:[%s1872_s6] sm:$0xff]  ;;  %v720_v60 = vmul.f32 %v1391_v28, %v1433_v51 }
 0x152   : > { %638 = vrot.lane.b32.xlu1 %v1431_v50, %s1206_s10 }
 0x153   : > { %v423_v62 = vpop.xlane.xlu1 %422  ;;  %v431_v4 = vsel %vm430_vm3, %v428_v0, 0.0  ;;  %v722_v0 = vmul.f32 %v1391_v28, %v1437_v52 }
 0x154   : > { %v425_v1 = vmul.f32 0.00390625, %v423_v62 }
 0x155   : > { %742 = vrot.lane.b32.xlu0 %v725_v63, %s1212_s26 }
 0x156   : > { %673 = vrot.lane.b32.xlu1 %v1427_v47, %s1207_s15  ;;  %v429_v2 = vmul.f32 %v427_v61, %v425_v1  ;;  %v453_v61 = vld [vmem:[%s1873_s7] sm:$0xff]  ;;  %s1815_s15 = scalar_lea.hbm %s1875_s9, %s1042_s28 }
 0x158   : > { %v432_v5 = vsel %vm430_vm3, %v429_v2, 0.0  ;;  %v454_v2 = vld [vmem:[%s1873_s7 + $0x8] sm:$0xff] }
 0x159   : > { %v433_v6 = vadd.f32 %v432_v5, %v431_v4  ;;  %865 = vrot.lane.b32.xlu0 %v850_v3, %s1213_s29  ;;  %v847_v3 = vmul.f32 %v1397_v31, %v1433_v51  ;;  %v849_v5 = vmul.f32 %v1397_v31, %v1437_v52  ;;  %v851_v52 = vmul.f32 %v1395_v30, %v1431_v50 }
 0x15a   : > { %759 = vrot.lane.b32.xlu1 %v1427_v47, %s1208_s17 }
 0x15b   : > { %v434_v7 = vrot.slane %v433_v6, 4 }
 0x15d   : > { %v435_v9 = vadd.f32 %v434_v7, %v433_v6  ;;  %597 = vrot.lane.b32.xlu0 %v584_v8, %s1211_s23  ;;  %v587_v6 = vmul.f32 %v1389_v27, %v1431_v50  ;;  %v852_v7 = vmul.f32 %v1395_v30, %v1439_v53  ;;  %v724_v8 = vmul.f32 %v1393_v29, %v1431_v50 }
 0x15e   : > { %800 = vrot.lane.b32.xlu1 %v1427_v47, %s1209_s18  ;;  %s1214_s18 = smov [#allocation4]  }
 0x15f   : > { %v436_v10 = vrot.slane %v435_v9, 2 }
 0x161   : > { %v437_v19 = vadd.f32 %v436_v10, %v435_v9  ;;  %734 = vrot.lane.b32.xlu0 %v721_v17, %s1212_s26 }
 0x162   : > { %892 = vrot.lane.b32.xlu1 %v1431_v50, %s1210_s22  ;;  %s1135_s22 = sshll.u32 %s1214_s18, 4  ;;  %s1136_s22 = int_to_ptr.vmem [resolvable:$false] %s1135_s22 }
 0x163   : > { %v438_v23 = vrot.slane %v437_v19, 1  ;;  %s1137_s24 = scalar_lea.vmem %s1136_s22, 1024 }
 0x165   : > { %v439_v48 = vadd.f32 %v438_v23, %v437_v19  ;;  %861 = vrot.lane.b32.xlu0 %v848_v45, %s1213_s29 }
 0x166   : > { %595 = vrot.lane.b32.xlu1 %v583_v24, %s1211_s23 }
 0x167   : > { %v441_v55 = vadd.f32 %v440_v46, %v439_v48 }
 0x169   : > { %v442_v57 = vmax.f32 %v441_v55, 0.0 }
 0x16a   : > { %599 = vrot.lane.b32.xlu1 %v585_v56, %s1211_s23 }
 0x16b   : > { %v448_v59 = vrot.slane %v442_v57, %v447_v49 }
 0x16d   : > { %v449_v62 = vmul.f32 %v448_v59, %v443_v58  ;;  %v450_v1 = vmul.f32 %v448_v59, %v444_v26 }
 0x16e   : > { %732 = vrot.lane.b32.xlu1 %v720_v60, %s1212_s26 }
 0x16f   : > { %v455_v63 = vadd.f32 %v453_v61, %v449_v62  ;;  %v456_v4 = vadd.f32 %v454_v2, %v450_v1 }
 0x171   : > { %1127 = vtanh.f32 %v455_v63 }
 0x172   : > { %736 = vrot.lane.b32.xlu1 %v722_v0, %s1212_s26  ;;  %1129 = vtanh.f32 %v456_v4 }
 0x176   : > { %859 = vrot.lane.b32.xlu1 %v847_v3, %s1213_s29 }
 0x17a   : > { %863 = vrot.lane.b32.xlu1 %v849_v5, %s1213_s29  ;;  %v507_v5 = vand.u32 127, %v445_v18 }
 0x17b   : > { %v1128_v28 = vpop.eup %1127 }
 0x17c   : > { %461 = vperm.xlu0 %1121, %v1128_v28   ;;  %v1130_v31 = vpop.eup %1129 }
 0x17e   : > { %603 = vrot.lane.b32.xlu1 %v587_v6, %s1211_s23  ;;  %s325_s23 = sand.u32 1, %s1185_s12  }
 0x17f   : > { %s1825_s5 = scalar_lea.sflag [#allocation5], %s325_s23 }
 0x180   : > { %869 = vrot.lane.b32.xlu0 %v852_v7, %s1213_s29  ;;  %v513_v7 = vand.u32 15, %v507_v5 }
 0x182   : > { %740 = vrot.lane.b32.xlu1 %v724_v8, %s1212_s26  ;;  %vm1629_vm5 = vcmp.ge.s32.totalorder %v513_v7, 1  ;;  %vm1635_vm6 = vcmp.le.s32.totalorder %v513_v7, 14  ;;  %s1033_s26 = sshll.u32 %s325_s23, 5 }
 0x183   : > { %s1787_s27 = scalar_lea.vmem [#allocation4], %s1033_s26 }
 0x186   : > { %466 = vperm.xlu1 %1122, %v1130_v31   ;;  %v508_v31 = vadd.s32 128, %v507_v5  ;;  %v545_v5 = vsel %vm1629_vm5, %v1433_v51, 0.0 }
 0x188   : > { %v520_v22 = vand.u32 15, %v508_v31 }
 0x18a   : > { %867 = vrot.lane.b32.xlu1 %v851_v52, %s1213_s29  ;;  %vm1649_vm9 = vcmp.ge.s32.totalorder %v520_v22, 1  ;;  %vm1662_vm11 = vcmp.le.s32.totalorder %v520_v22, 14  ;;  %s967_s29 = sshll.u32 %s1787_s27, 4  ;;  %s1817_s29 = int_to_ptr.vmem [resolvable:$true] %s967_s29 }
 0x18b   : > { %s1131_s17 = scalar_lea.vmem %s1817_s29, 512  ;;  %p1138_p0 = scmp.lt.s32.totalorder %s1817_s29, %s1136_s22 }
 0x18c   : > { %v631_v27 = vpop.permute.xlu1 %630  ;;  %p1132_p11 = scmp.ne.s32.totalorder %s1817_s29, %s1131_s17  ;;  %p1139_p1 = scmp.lt.s32.totalorder %s1137_s24, %s1131_s17 }
 0x18e   : > { %p1133_p12 = pnand %p1132_p11, %p1308_p5  ;;  %p1140_p2 = por %p1139_p1, %p1138_p0 }
 0x18f   : > { %v1576_v10 = vpop.permute.xlu0 %640 }
 0x190   : > { %v1574_v9 = vpop.permute.xlu1 %634  ;;  %p1134_p13 = pneg %p1133_p12 }
 0x192   : > { %p1141_p3 = pnand %p1140_p2, %p1134_p13 }
 0x193   : > { %v1580_v17 = vpop.permute.xlu0 %675 }
 0x194   : > { %v1578_v53 = vpop.permute.xlu1 %636 }
 0x197   : > { %v1582_v19 = vpop.permute.xlu0 %761 }
 0x198   : > { %v672_v29 = vpop.permute.xlu1 %671 }
 0x19b   : > { %v1586_v23 = vpop.permute.xlu0 %802 }
 0x19c   : > { %v1584_v20 = vpop.permute.xlu1 %677 }
 0x19f   : > { %v1590_v30 = vpop.permute.xlu0 %890 }
 0x1a0   : > { %v1588_v24 = vpop.permute.xlu1 %681  ;;  %1897 = vst [vmem:[#allocation16_spill] sm:$0xff] %v1590_v30 }
 0x1a3   : > { %v1592_v46 = vpop.permute.xlu0 %894 }
 0x1a4   : > { %v758_v45 = vpop.permute.xlu1 %757  ;;  %1898 = vst [vmem:[#allocation17_spill] sm:$0xff] %v1592_v46 }
 0x1a7   : > { %v633_v49 = vpop.permute.xlu0 %632 }
 0x1a8   : > { %v1594_v48 = vpop.permute.xlu1 %763  ;;  %v643_v18 = vsel %vm642_vm4, %v631_v27, %v633_v49 }
 0x1a9   : > { %v651_v40 = vsel %vm1635_vm6, %v643_v18, 0.0 }
 0x1aa   : > { %v663_v51 = vmul.f32 %v1401_v33, %v651_v40 }
 0x1ab   : > { %v1598_v56 = vpop.permute.xlu0 %679 }
 0x1ac   : > { %v1596_v55 = vpop.permute.xlu1 %767 }
 0x1af   : > { %v1602_v58 = vpop.permute.xlu0 %765 }
 0x1b0   : > { %v1600_v57 = vpop.permute.xlu1 %798 }
 0x1b3   : > { %v1606_v60 = vpop.permute.xlu0 %806 }
 0x1b4   : > { %v1604_v59 = vpop.permute.xlu1 %804 }
 0x1b7   : > { %v1610_v62 = vpop.permute.xlu0 %886 }
 0x1b8   : > { %v1608_v61 = vpop.permute.xlu1 %808 }
 0x1bb   : > { %v1614_v63 = vpop.permute.xlu0 %601 }
 0x1bc   : > { %v1612_v26 = vpop.permute.xlu1 %884 }
 0x1bf   : > { %v1618_v1 = vpop.permute.xlu0 %605 }
 0x1c0   : > { %v1616_v0 = vpop.permute.xlu1 %888 }
 0x1c3   : > { %v1622_v3 = vpop.permute.xlu0 %738 }
 0x1c4   : > { %v1620_v2 = vpop.permute.xlu1 %638 }
 0x1c7   : > { %v1625_v28 = vpop.permute.xlu0 %742 }
 0x1c8   : > { %v674_v4 = vpop.permute.xlu1 %673 }
 0x1c9   : > { %v684_v21 = vsel %vm683_vm7, %v672_v29, %v674_v4 }
 0x1ca   : > { %v692_v31 = vsel %vm1629_vm5, %v684_v21, 0.0  ;;  %v644_v21 = vsel %vm642_vm4, %v633_v49, %v1574_v9 }
 0x1cb   : > { %v1633_v16 = vpop.permute.xlu0 %865 }
 0x1cc   : > { %v760_v6 = vpop.permute.xlu1 %759  ;;  %1901 = vst [vmem:[#allocation18_spill] sm:$0xff] %v1633_v16  ;;  %v561_v16 = vmul.f32 %v1419_v42, %v545_v5  ;;  %v546_v5 = vsel %vm1649_vm9, %v1427_v47, 0.0  ;;  %v652_v47 = vsel %vm1662_vm11, %v644_v21, 0.0 }
 0x1cd   : > { %v770_v18 = vsel %vm769_vm10, %v758_v45, %v760_v6  ;;  %v562_v45 = vmul.f32 %v1419_v42, %v546_v5  ;;  %v771_v5 = vsel %vm769_vm10, %v760_v6, %v1582_v19  ;;  %v645_v19 = vsel %vm642_vm4, %v1578_v53, %v1620_v2 }
 0x1cf   : > { %v598_v7 = vpop.permute.xlu0 %597 }
 0x1d0   : > { %v1627_v8 = vpop.permute.xlu1 %800 }
 0x1d4   : > { %v1640_v43 = vpop.permute.xlu1 %892 }
 0x1d5   : > { %1904 = vst [vmem:[#allocation19_spill] sm:$0xff] %v1640_v43  ;;  %v704_v43 = vmul.f32 %v1403_v34, %v692_v31  ;;  %v685_v31 = vsel %vm683_vm7, %v674_v4, %v1580_v17  ;;  %v686_v17 = vsel %vm683_vm7, %v1584_v20, %v1598_v56  ;;  %v646_v20 = vsel %vm642_vm4, %v1620_v2, %v1576_v10 }
 0x1d8   : > { %v596_v46 = vpop.permute.xlu1 %595 }
 0x1d9   : > { %v608_v30 = vsel %vm607_vm8, %v596_v46, %v598_v7  ;;  %v735_v46 = vpop.permute.xlu0 %734 }
 0x1da   : > { %v616_v29 = vadd.f32 %v608_v30, %v561_v16  ;;  %v778_v30 = vsel %vm1635_vm6, %v770_v18, 0.0 }
 0x1dc   : > { %v667_v15 = vadd.f32 %v663_v51, %v616_v29  ;;  %v600_v13 = vpop.permute.xlu1 %599 }
 0x1dd   : > { %v609_v16 = vsel %vm607_vm8, %v598_v7, %v600_v13  ;;  %v790_v13 = vmul.f32 %v1407_v36, %v778_v30 }
 0x1de   : > { %v708_v40 = vadd.f32 %v704_v43, %v667_v15  ;;  %v617_v51 = vadd.f32 %v609_v16, %v562_v45  ;;  %v664_v15 = vmul.f32 %v1401_v33, %v652_v47  ;;  %v693_v43 = vsel %vm1649_vm9, %v685_v31, 0.0 }
 0x1df   : > { %v705_v18 = vmul.f32 %v1403_v34, %v693_v43  ;;  %v687_v33 = vsel %vm683_vm7, %v1598_v56, %v1588_v24  ;;  %v548_v34 = vsel %vm1649_vm9, %v1431_v50, 0.0  ;;  %v779_v24 = vsel %vm1662_vm11, %v771_v5, 0.0  ;;  %v862_v43 = vpop.permute.xlu0 %861 }
 0x1e0   : > { %v733_v22 = vpop.permute.xlu1 %732  ;;  %v668_v29 = vadd.f32 %v664_v15, %v617_v51  ;;  %v694_v56 = vsel %vm1629_vm5, %v686_v17, 0.0  ;;  %v812_v50 = vsel %vm810_vm13, %v1627_v8, %v1586_v23  ;;  %v695_v53 = vsel %vm1649_vm9, %v687_v33, 0.0 }
 0x1e1   : > { %v745_v9 = vsel %vm744_vm12, %v733_v22, %v735_v46  ;;  %v564_v2 = vmul.f32 %v1385_v25, %v548_v34  ;;  %v653_v45 = vsel %vm1635_vm6, %v645_v19, 0.0  ;;  %v791_v47 = vmul.f32 %v1407_v36, %v779_v24 }
 0x1e2   : > { %v753_v49 = vadd.f32 %v745_v9, %v708_v40  ;;  %v709_v16 = vadd.f32 %v705_v18, %v668_v29  ;;  %v547_v40 = vsel %vm1629_vm5, %v1445_v54, 0.0  ;;  %v811_v54 = vsel %vm810_vm13, %v1600_v57, %v1627_v8 }
 0x1e3   : > { %v563_v10 = vmul.f32 %v1385_v25, %v547_v40  ;;  %v654_v57 = vsel %vm1662_vm11, %v646_v20, 0.0  ;;  %v706_v23 = vmul.f32 %v1405_v35, %v694_v56  ;;  %v819_v8 = vsel %vm1629_vm5, %v811_v54, 0.0 }
 0x1e4   : > { %v794_v42 = vadd.f32 %v790_v13, %v753_v49  ;;  %v737_v7 = vpop.permute.xlu1 %736  ;;  %v707_v25 = vmul.f32 %v1405_v35, %v695_v53  ;;  %v772_v22 = vsel %vm769_vm10, %v1594_v48, %v1602_v58  ;;  %v773_v31 = vsel %vm769_vm10, %v1602_v58, %v1596_v55 }
 0x1e5   : > { %v746_v4 = vsel %vm744_vm12, %v735_v46, %v737_v7  ;;  %v820_v46 = vsel %vm1649_vm9, %v812_v50, 0.0  ;;  %v897_v51 = vsel %vm896_vm14, %v1612_v26, %v1610_v62  ;;  %v898_v9 = vsel %vm896_vm14, %v1610_v62, %v1616_v0 }
 0x1e6   : > { %v754_v6 = vadd.f32 %v746_v4, %v709_v16  ;;  %v665_v13 = vmul.f32 %v1399_v32, %v653_v45  ;;  %v666_v35 = vmul.f32 %v1399_v32, %v654_v57  ;;  %v831_v48 = vmul.f32 %v1413_v39, %v819_v8 }
 0x1e7   : > { %v832_v15 = vmul.f32 %v1413_v39, %v820_v46  ;;  %v813_v32 = vsel %vm810_vm13, %v1604_v59, %v1606_v60  ;;  %v814_v39 = vsel %vm810_vm13, %v1606_v60, %v1608_v61  ;;  %v781_v59 = vsel %vm1662_vm11, %v773_v31, 0.0 }
 0x1e8   : > { %v860_v21 = vpop.permute.xlu1 %859  ;;  %v795_v36 = vadd.f32 %v791_v47, %v754_v6  ;;  %v835_v29 = vadd.f32 %v831_v48, %v794_v42  ;;  %v821_v60 = vsel %vm1629_vm5, %v813_v32, 0.0  ;;  %v822_v61 = vsel %vm1649_vm9, %v814_v39, 0.0  ;;  %v1909_v47 = vld [vmem:[#allocation11_spill] sm:$0xff]  ;;  %v1917_v39 = vld [vmem:[#allocation12_spill] sm:$0xff] }
 0x1e9   : > { %v872_v26 = vsel %vm871_vm15, %v860_v21, %v862_v43  ;;  %v780_v21 = vsel %vm1635_vm6, %v772_v22, 0.0  ;;  %v793_v52 = vmul.f32 %v1409_v37, %v781_v59  ;;  %v833_v53 = vmul.f32 %v1411_v38, %v821_v60  ;;  %v1911_v22 = vld [vmem:[#allocation9_spill] sm:$0xff]  ;;  %v1920_v59 = vld [vmem:[#allocation8_spill] sm:$0xff] }
 0x1ea   : > { %v836_v18 = vadd.f32 %v832_v15, %v795_v36  ;;  %v880_v33 = vadd.f32 %v872_v26, %v835_v29  ;;  %v792_v56 = vmul.f32 %v1409_v37, %v780_v21  ;;  %v1912_v36 = vld [vmem:[#allocation19_spill] sm:$0xff]  ;;  %v1916_v26 = vld [vmem:[#allocation14_spill] sm:$0xff] }
 0x1ec   : > { %v864_v30 = vpop.permute.xlu1 %863 }
 0x1ed   : > { %v873_v62 = vsel %vm871_vm15, %v862_v43, %v864_v30  ;;  %v834_v30 = vmul.f32 %v1411_v38, %v822_v61  ;;  %v1915_v43 = vld [vmem:[#allocation18_spill] sm:$0xff] }
 0x1ee   : > { %v881_v16 = vadd.f32 %v873_v62, %v836_v18  ;;  %v1918_v18 = vld [vmem:[#allocation13_spill] sm:$0xff] }
 0x1f0   : > { %v604_v49 = vpop.permute.xlu1 %603 }
 0x1f1   : > { %v610_v55 = vsel %vm607_vm8, %v1614_v63, %v604_v49  ;;  %v611_v58 = vsel %vm607_vm8, %v604_v49, %v1618_v1  ;;  %v905_v63 = vsel %vm1635_vm6, %v897_v51, 0.0  ;;  %v906_v1 = vsel %vm1662_vm11, %v898_v9, 0.0  ;;  %v1914_v9 = vld [vmem:[#allocation17_spill] sm:$0xff] }
 0x1f2   : > { %v618_v0 = vadd.f32 %v610_v55, %v563_v10  ;;  %v619_v7 = vadd.f32 %v611_v58, %v564_v2  ;;  %v917_v34 = vmul.f32 %v1417_v41, %v905_v63  ;;  %v918_v19 = vmul.f32 %v1417_v41, %v906_v1  ;;  %v1919_v1 = vld [vmem:[#allocation15_spill] sm:$0xff] }
 0x1f4   : > { %v669_v5 = vadd.f32 %v665_v13, %v618_v0  ;;  %v670_v17 = vadd.f32 %v666_v35, %v619_v7  ;;  %v741_v4 = vpop.permute.xlu1 %740  ;;  %v921_v50 = vadd.f32 %v917_v34, %v880_v33  ;;  %v922_v6 = vadd.f32 %v918_v19, %v881_v16  ;;  %v1921_v16 = vld [vmem:[#allocation10_spill] sm:$0xff] }
 0x1f5   : > { %v747_v20 = vsel %vm744_vm12, %v1622_v3, %v741_v4  ;;  %v748_v24 = vsel %vm744_vm12, %v741_v4, %v1625_v28 }
 0x1f6   : > { %v710_v42 = vadd.f32 %v706_v23, %v669_v5  ;;  %v711_v40 = vadd.f32 %v707_v25, %v670_v17  ;;  %v937_v28 = vadd.f32 %v1423_v44, %v921_v50  ;;  %v938_v57 = vadd.f32 %v1423_v44, %v922_v6  ;;  %v1910_v25 = vld [vmem:[#allocation7_spill] sm:$0xff]  ;;  %v1913_v44 = vld [vmem:[#allocation16_spill] sm:$0xff] }
 0x1f7   : > { %v899_v51 = vsel %vm896_vm14, %v1913_v44, %v1912_v36 }
 0x1f8   : > { %v755_v27 = vadd.f32 %v747_v20, %v710_v42  ;;  %v756_v54 = vadd.f32 %v748_v24, %v711_v40  ;;  %v907_v35 = vsel %vm1635_vm6, %v899_v51, 0.0 }
 0x1f9   : > { %v919_v62 = vmul.f32 %v1916_v26, %v907_v35 }
 0x1fa   : > { %v796_v41 = vadd.f32 %v792_v56, %v755_v27  ;;  %v797_v10 = vadd.f32 %v793_v52, %v756_v54 }
 0x1fb   : > { %v462_v3 = vpop.permute.xlu0 %461 }
 0x1fc   : > { %v837_v2 = vadd.f32 %v833_v53, %v796_v41  ;;  %v838_v45 = vadd.f32 %v834_v30, %v797_v10  ;;  %v469_v37 = vmul.f32 %v462_v3, %v1369_v11  ;;  %v470_v23 = vmul.f32 %v462_v3, %v1909_v47 }
 0x1fd   : > { %v900_v11 = vsel %vm896_vm14, %v1912_v36, %v1914_v9 }
 0x1fe   : > { %v941_v8 = vmul.f32 %v937_v28, %v469_v37  ;;  %v942_v46 = vmul.f32 %v938_v57, %v470_v23  ;;  %v908_v49 = vsel %vm1662_vm11, %v900_v11, 0.0 }
 0x1ff   : > { %v870_v48 = vpop.permute.xlu0 %869  ;;  %v920_v0 = vmul.f32 %v1916_v26, %v908_v49 }
 0x200   : > { %v945_v38 = vadd.f32 %v941_v8, %v1910_v25  ;;  %v946_v31 = vadd.f32 %v942_v46, %v1911_v22 }
 0x202   : > { %949 = vst [vmem:[%s1787_s27] sm:$0xff] %v945_v38  ;;  %950 = vst [vmem:[%s1787_s27 + $0x8] sm:$0xff] %v946_v31 }
 0x205   : > { %v467_v13 = vpop.permute.xlu1 %466 }
 0x206   : > { %v471_v29 = vmul.f32 %v467_v13, %v1917_v39  ;;  %v472_v63 = vmul.f32 %v467_v13, %v1918_v18 }
 0x209   : > { %v868_v15 = vpop.permute.xlu1 %867 }
 0x20a   : > { %v874_v55 = vsel %vm871_vm15, %v1915_v43, %v868_v15  ;;  %v875_v58 = vsel %vm871_vm15, %v868_v15, %v870_v48 }
 0x20b   : > { %v882_v7 = vadd.f32 %v874_v55, %v837_v2  ;;  %v883_v14 = vadd.f32 %v875_v58, %v838_v45 }
 0x20d   : > { %v923_v32 = vadd.f32 %v919_v62, %v882_v7  ;;  %v924_v12 = vadd.f32 %v920_v0, %v883_v14 }
 0x20f   : > { %v939_v5 = vadd.f32 %v1919_v1, %v923_v32  ;;  %v940_v17 = vadd.f32 %v1919_v1, %v924_v12 }
 0x211   : > { %v943_v4 = vmul.f32 %v939_v5, %v471_v29  ;;  %v944_v21 = vmul.f32 %v940_v17, %v472_v63 }
 0x213   : > { %v947_v33 = vadd.f32 %v943_v4, %v1920_v59  ;;  %v948_v60 = vadd.f32 %v944_v21, %v1921_v16 }
 0x215   : > { %951 = vst [vmem:[%s1787_s27 + $0x10] sm:$0xff] %v947_v33  ;;  %952 = vst [vmem:[%s1787_s27 + $0x18] sm:$0xff] %v948_v60 }
 0x216   : > { %1144 = shalt.err (!%p1141_p3)
}
 0x217   : > { %s1145_s25 = scalar_lea.hbm %s1815_s15, 512  ;;  %s1149_s27 = scalar_lea.hbm %s1875_s9, 1024 }
 0x218   : > { %p1146_p4 = scmp.ne.s32.totalorder %s1815_s15, %s1145_s25  ;;  %p1150_p9 = scmp.lt.u32.totalorder %s1815_s15, %s1875_s9 }
 0x219   : > { %p1151_p10 = scmp.lt.u32.totalorder %s1149_s27, %s1145_s25  ;;  %p1153_p12 = scmp.lt.u32.totalorder %s1145_s25, %s1815_s15 }
 0x21a   : > { %p1147_p7 = pnand %p1146_p4, %p1308_p5 }
 0x21b   : > { %p1152_p11 = por %p1151_p10, %p1150_p9 }
 0x21c   : > { %p1148_p8 = pneg %p1147_p7 }
 0x21d   : > { %p1154_p13 = por %p1153_p12, %p1152_p11 }
 0x21f   : > { %p1155_p0 = pnand %p1154_p13, %p1148_p8 }
 0x221   : > { %1158 = shalt.err (!%p1155_p0)
}
 0x222   : > { %s1215_s10 = smov 256   ;;  %s1216_s17 = smov 16  }
 0x223   : > { %1043 = dma.vmem_to_hbm [thread:$0]  (%p1308_p5), %s1817_s29, 512, %s1815_s15, %s1825_s5, %s1215_s10, %s1215_s10, %s1216_s17  }
 0x224 PF: > { %p1049_p1 = scmp.ge.s32.totalorder %s1193_s14, 2  ;;  %s982_s18 = sand.u32 1, %s1181_s11  }
 0x225   : > { %s983_s22 = scalar_lea.sflag [#allocation5], %s982_s18 }
 0x226   : > { %p1046_p2 = pnand %p1049_p1, %p1312_p6 }
 0x228   : > { %1176 = dma.done.wait (!%p1046_p2), %s983_s22, 512  }
 0x229   : > { %1178 = vsyncadd (!%p1046_p2), %s983_s22, 4294966784  ;;  %p21_p3 = scmp.ge.s32.totalorder %s1295_s16, 4   ;;  %s1922_s11 = smov %s1185_s12 }
 0x22a   : > { %s1923_s12 = smov %s1189_s13  ;;  %s1924_s13 = smov %s1306_s19 }
 0x22b   : > { %s1925_s14 = smov %s1295_s16  ;;  %23 = sbr.rel (!%p21_p3) target bundleno = 6 (0x6), region = 91 }
 0x232   :  { %988 = vsyncpa [#allocation5], 1 }
 0x233   :  { %990 = vsyncpa [#allocation5 + $0x1], 1 }

</bundles_post_ra>
